<compile_context>
chip_gen: v7x
topology: tpu7x:2x2x1
jax: 0.10.0
libtpu: 0.0.40
codegen_flags: <defaults>
</compile_context>

<pallas_src>
import functools

import jax
import jax.numpy as jnp
from jax import lax
from jax.experimental import pallas as pl
from jax.experimental.pallas import tpu as pltpu

INPUT_DIM = 30
HIDDEN = 224
N_LAYERS = 3
BN_EPS = 1e-5

IN_PAD = 32            # 30 -> 32 input features
HID_PAD = 256          # 224 -> 256 hidden (full MXU tiles / vreg lanes)
TILE_B_MAX = 4096      # amortize ~0.35us per-grid-step overhead
MIN_SPLIT_ROWS = 1024  # above this, keep >=2 grid steps (v7x has 2 TCs)
VMEM_LIMIT_BYTES = 48 * 1024 * 1024


def _round_up(n, m):
    return ((n + m - 1) // m) * m


def fraudnet_kernel(x_ref, w1_ref, b1_ref, w2_ref, b2_ref, w3_ref, b3_ref,
                    wo_ref, o_ref):
    # x streamed as f32; bf16 cast done in-kernel (free VPU filler, kernel is
    # MXU-bound so the slightly larger f32 DMA stays hidden).
    x = x_ref[...].astype(jnp.bfloat16)

    # Layer 1: Linear(+folded BN) -> ReLU   (Dropout = identity in eval mode)
    h = jnp.dot(x, w1_ref[...], preferred_element_type=jnp.float32)
    h = jnp.maximum(h + b1_ref[...], 0.0)
    # Layer 2
    h = jnp.dot(h.astype(jnp.bfloat16), w2_ref[...],
                preferred_element_type=jnp.float32)
    h = jnp.maximum(h + b2_ref[...], 0.0)
    # Layer 3
    h = jnp.dot(h.astype(jnp.bfloat16), w3_ref[...],
                preferred_element_type=jnp.float32)
    h = jnp.maximum(h + b3_ref[...], 0.0)

    # Output head Linear(HID -> 1) as an MXU contraction that yields a
    # lane-major (1, tile_b) row directly (output bias bo added in wrapper).
    y = lax.dot_general(wo_ref[...], h.astype(jnp.bfloat16),
                        dimension_numbers=(((1,), (1,)), ((), ())),
                        preferred_element_type=jnp.float32)   # (1, tile_b)
    o_ref[0, :, :] = y


def _fold_bn(w, b, gamma, beta, mean, var):
    """Fold eval-mode BatchNorm1d into the preceding Linear (w is (in, out))."""
    scale = gamma * lax.rsqrt(var + BN_EPS)          # (1, d_out)
    return w * scale, (b - mean) * scale + beta


def _pad2(a, rows, cols):
    return jnp.pad(a, ((0, rows - a.shape[0]), (0, cols - a.shape[1])))


def prepare_params(params):
    """One-time: fold BN into Linears, zero-pad dims, cast matmul weights to
    bf16. Cache the result; it is constant for inference."""
    w1, b1 = _fold_bn(*params[0:6])
    w2, b2 = _fold_bn(*params[6:12])
    w3, b3 = _fold_bn(*params[12:18])
    wo, bo = params[18], params[19]                  # (HIDDEN, 1), (1, 1)
    return {
        "w1": _pad2(w1, IN_PAD, HID_PAD).astype(jnp.bfloat16),
        "b1": _pad2(b1, 1, HID_PAD),                 # biases stay f32
        "w2": _pad2(w2, HID_PAD, HID_PAD).astype(jnp.bfloat16),
        "b2": _pad2(b2, 1, HID_PAD),
        "w3": _pad2(w3, HID_PAD, HID_PAD).astype(jnp.bfloat16),
        "b3": _pad2(b3, 1, HID_PAD),
        "wo": _pad2(wo.T, 1, HID_PAD).astype(jnp.bfloat16),
        "bo": bo,
    }


def _choose_tiling(batch):
    rows = _round_up(max(batch, 1), 8)
    num_tiles = pl.cdiv(rows, TILE_B_MAX)
    if rows >= MIN_SPLIT_ROWS:
        # v7x: 2 TensorCores share work only via the "parallel" grid axis, so
        # guarantee an even number (>= 2) of grid steps when there is enough
        # batch to split.
        num_tiles = max(num_tiles, 2)
        if num_tiles % 2:
            num_tiles += 1
    tile_b = _round_up(pl.cdiv(rows, num_tiles), 8)
    return tile_b, num_tiles


@jax.jit
def fraudnet_forward(x, prepared):
    B, F = x.shape
    assert F == INPUT_DIM
    tile_b, num_tiles = _choose_tiling(B)
    b_pad = tile_b * num_tiles

    # x stays f32; padded batch rows / feature cols are zeros (sliced off /
    # matched by zero weight rows, so results are exact).
    xb = jnp.pad(x, ((0, b_pad - B), (0, IN_PAD - F)))

    def resident(shape):
        # Constant index_map -> DMA'd once, stays VMEM-resident across steps.
        return pl.BlockSpec(shape, lambda i: (0,) * len(shape))

    out_slab = pl.pallas_call(
        fraudnet_kernel,
        out_shape=jax.ShapeDtypeStruct((num_tiles, 1, tile_b), jnp.float32),
        grid=(num_tiles,),
        in_specs=[
            pl.BlockSpec((tile_b, IN_PAD), lambda i: (i, 0)),   # x: streamed
            resident((IN_PAD, HID_PAD)),                        # w1'
            resident((1, HID_PAD)),                             # b1'
            resident((HID_PAD, HID_PAD)),                       # w2'
            resident((1, HID_PAD)),                             # b2'
            resident((HID_PAD, HID_PAD)),                       # w3'
            resident((1, HID_PAD)),                             # b3'
            resident((1, HID_PAD)),                             # wo row
        ],
        out_specs=pl.BlockSpec((1, 1, tile_b), lambda i: (i, 0, 0)),
        compiler_params=pltpu.CompilerParams(
            dimension_semantics=("parallel",),
            vmem_limit_bytes=VMEM_LIMIT_BYTES),
    )(xb, prepared["w1"], prepared["b1"], prepared["w2"], prepared["b2"],
      prepared["w3"], prepared["b3"], prepared["wo"])

    # Lane-dense slab -> (B, 1); output bias folded here (single cheap add).
    return out_slab.reshape(b_pad)[:B, None] + prepared["bo"]


def init_params(key):
    """Deterministic parameter init matching FraudNet's shapes."""
    params = []
    dims = [(INPUT_DIM, HIDDEN), (HIDDEN, HIDDEN), (HIDDEN, HIDDEN)]
    keys = jax.random.split(key, 4 * N_LAYERS + 2)
    ki = 0
    for (d_in, d_out) in dims:
        scale = 1.0 / jnp.sqrt(jnp.float32(d_in))
        w = jax.random.uniform(keys[ki], (d_in, d_out), jnp.float32, -scale, scale); ki += 1
        b = jax.random.uniform(keys[ki], (1, d_out), jnp.float32, -scale, scale); ki += 1
        gamma = 1.0 + 0.1 * jax.random.normal(keys[ki], (1, d_out), jnp.float32); ki += 1
        beta = 0.1 * jax.random.normal(keys[ki], (1, d_out), jnp.float32); ki += 1
        run_mean = jnp.zeros((1, d_out), jnp.float32)
        run_var = jnp.ones((1, d_out), jnp.float32)
        params += [w, b, gamma, beta, run_mean, run_var]
    scale = 1.0 / jnp.sqrt(jnp.float32(HIDDEN))
    wo = jax.random.uniform(keys[ki], (HIDDEN, 1), jnp.float32, -scale, scale); ki += 1
    bo = jax.random.uniform(keys[ki], (1, 1), jnp.float32, -scale, scale); ki += 1
    params += [wo, bo]
    return params


def reference_forward(x, params):
    """Pure-JAX f32 reference (unfused BN, eval mode) for correctness check."""
    h = x
    for i in range(N_LAYERS):
        w, b, g, be, m, v = params[6 * i: 6 * i + 6]
        z = h @ w + b
        z = (z - m) * lax.rsqrt(v + BN_EPS) * g + be
        h = jnp.maximum(z, 0.0)
    wo, bo = params[-2], params[-1]
    return h @ wo + bo


if __name__ == "__main__":
    # TODO(synk): training-mode BatchNorm (batch statistics) and Dropout
    # sampling are not implemented; this kernel is the eval-mode forward.
    key = jax.random.PRNGKey(0)
    k_x, k_p = jax.random.split(key)
    B = 6   # deliberately not a multiple of 8 to exercise batch padding
    x = jax.random.normal(k_x, (B, INPUT_DIM), jnp.float32)
    params = init_params(k_p)
    prepared = prepare_params(params)   # one-time fold/pad/cast, cached

    out = jax.block_until_ready(fraudnet_forward(x, prepared))
    ref = reference_forward(x, params)

    assert out.shape == (B, 1)
    # bf16 matmul operands (f32 accumulate) vs pure-f32 reference -> loose tol.
    assert jnp.allclose(out, ref, atol=5e-2, rtol=5e-2), "mismatch vs reference"
    print("KERNEL_OK")
</pallas_src>

<mosaic_0001>
module attributes {stable_mosaic.version = 11 : i64} {
  func.func @fraudnet_kernel(%arg0: i32, %arg1: memref<8x32xf32, #tpu.memory_space<vmem>>, %arg2: memref<32x256xbf16, #tpu.memory_space<vmem>>, %arg3: memref<1x256xf32, #tpu.memory_space<vmem>>, %arg4: memref<256x256xbf16, #tpu.memory_space<vmem>>, %arg5: memref<1x256xf32, #tpu.memory_space<vmem>>, %arg6: memref<256x256xbf16, #tpu.memory_space<vmem>>, %arg7: memref<1x256xf32, #tpu.memory_space<vmem>>, %arg8: memref<1x256xbf16, #tpu.memory_space<vmem>>, %arg9: memref<1x1x8xf32, #tpu.memory_space<vmem>>) attributes {dimension_semantics = [#tpu.dimension_semantics<parallel>], iteration_bounds = array<i64: 1>, scalar_prefetch = 0 : i64, scratch_operands = 0 : i64, tpu.core_type = #tpu.core_type<tc>, window_params = [{transform_indices = @transform_0, window_bounds = array<i64: 8, 32>}, {pipeline_mode = #tpu.pipeline_mode<synchronous>, transform_indices = @transform_1, window_bounds = array<i64: 32, 256>}, {pipeline_mode = #tpu.pipeline_mode<synchronous>, transform_indices = @transform_2, window_bounds = array<i64: 1, 256>}, {pipeline_mode = #tpu.pipeline_mode<synchronous>, transform_indices = @transform_3, window_bounds = array<i64: 256, 256>}, {pipeline_mode = #tpu.pipeline_mode<synchronous>, transform_indices = @transform_4, window_bounds = array<i64: 1, 256>}, {pipeline_mode = #tpu.pipeline_mode<synchronous>, transform_indices = @transform_5, window_bounds = array<i64: 256, 256>}, {pipeline_mode = #tpu.pipeline_mode<synchronous>, transform_indices = @transform_6, window_bounds = array<i64: 1, 256>}, {pipeline_mode = #tpu.pipeline_mode<synchronous>, transform_indices = @transform_7, window_bounds = array<i64: 1, 256>}, {transform_indices = @transform_8, window_bounds = array<i64: 1, 1, 8>}]} {
    %c0 = arith.constant 0 : index
    %c0_0 = arith.constant 0 : index
    %0 = vector.load %arg1[%c0, %c0_0] : memref<8x32xf32, #tpu.memory_space<vmem>>, vector<8x32xf32>
    %1 = arith.truncf %0 : vector<8x32xf32> to vector<8x32xbf16>
    %c0_1 = arith.constant 0 : index
    %c0_2 = arith.constant 0 : index
    %2 = vector.load %arg2[%c0_1, %c0_2] : memref<32x256xbf16, #tpu.memory_space<vmem>>, vector<32x256xbf16>
    %cst = arith.constant dense<0.000000e+00> : vector<8x256xf32>
    %3 = tpu.matmul %1, %2, %cst {dimension_numbers = #tpu.dot_dimension_numbers<[1], [0], [0], [1], [0, 0, 1, 1], [], []>} : vector<8x32xbf16>, vector<32x256xbf16>, vector<8x256xf32> -> vector<8x256xf32>
    %c0_3 = arith.constant 0 : index
    %c0_4 = arith.constant 0 : index
    %4 = vector.load %arg3[%c0_3, %c0_4] : memref<1x256xf32, #tpu.memory_space<vmem>>, vector<1x256xf32>
    %5 = vector.broadcast %4 : vector<1x256xf32> to vector<8x256xf32>
    %6 = arith.addf %3, %5 : vector<8x256xf32>
    %cst_5 = arith.constant 0.000000e+00 : f32
    %7 = vector.broadcast %cst_5 : f32 to vector<8x256xf32>
    %8 = arith.maximumf %6, %7 : vector<8x256xf32>
    %9 = arith.truncf %8 : vector<8x256xf32> to vector<8x256xbf16>
    %c0_6 = arith.constant 0 : index
    %c0_7 = arith.constant 0 : index
    %10 = vector.load %arg4[%c0_6, %c0_7] : memref<256x256xbf16, #tpu.memory_space<vmem>>, vector<256x256xbf16>
    %cst_8 = arith.constant dense<0.000000e+00> : vector<8x256xf32>
    %11 = tpu.matmul %9, %10, %cst_8 {dimension_numbers = #tpu.dot_dimension_numbers<[1], [0], [0], [1], [0, 0, 1, 1], [], []>} : vector<8x256xbf16>, vector<256x256xbf16>, vector<8x256xf32> -> vector<8x256xf32>
    %c0_9 = arith.constant 0 : index
    %c0_10 = arith.constant 0 : index
    %12 = vector.load %arg5[%c0_9, %c0_10] : memref<1x256xf32, #tpu.memory_space<vmem>>, vector<1x256xf32>
    %13 = vector.broadcast %12 : vector<1x256xf32> to vector<8x256xf32>
    %14 = arith.addf %11, %13 : vector<8x256xf32>
    %cst_11 = arith.constant 0.000000e+00 : f32
    %15 = vector.broadcast %cst_11 : f32 to vector<8x256xf32>
    %16 = arith.maximumf %14, %15 : vector<8x256xf32>
    %17 = arith.truncf %16 : vector<8x256xf32> to vector<8x256xbf16>
    %c0_12 = arith.constant 0 : index
    %c0_13 = arith.constant 0 : index
    %18 = vector.load %arg6[%c0_12, %c0_13] : memref<256x256xbf16, #tpu.memory_space<vmem>>, vector<256x256xbf16>
    %cst_14 = arith.constant dense<0.000000e+00> : vector<8x256xf32>
    %19 = tpu.matmul %17, %18, %cst_14 {dimension_numbers = #tpu.dot_dimension_numbers<[1], [0], [0], [1], [0, 0, 1, 1], [], []>} : vector<8x256xbf16>, vector<256x256xbf16>, vector<8x256xf32> -> vector<8x256xf32>
    %c0_15 = arith.constant 0 : index
    %c0_16 = arith.constant 0 : index
    %20 = vector.load %arg7[%c0_15, %c0_16] : memref<1x256xf32, #tpu.memory_space<vmem>>, vector<1x256xf32>
    %21 = vector.broadcast %20 : vector<1x256xf32> to vector<8x256xf32>
    %22 = arith.addf %19, %21 : vector<8x256xf32>
    %cst_17 = arith.constant 0.000000e+00 : f32
    %23 = vector.broadcast %cst_17 : f32 to vector<8x256xf32>
    %24 = arith.maximumf %22, %23 : vector<8x256xf32>
    %c0_18 = arith.constant 0 : index
    %c0_19 = arith.constant 0 : index
    %25 = vector.load %arg8[%c0_18, %c0_19] : memref<1x256xbf16, #tpu.memory_space<vmem>>, vector<1x256xbf16>
    %26 = arith.truncf %24 : vector<8x256xf32> to vector<8x256xbf16>
    %cst_20 = arith.constant dense<0.000000e+00> : vector<1x8xf32>
    %27 = tpu.matmul %25, %26, %cst_20 {dimension_numbers = #tpu.dot_dimension_numbers<[1], [1], [0], [0], [0, 0, 1, 0], [], []>} : vector<1x256xbf16>, vector<8x256xbf16>, vector<1x8xf32> -> vector<1x8xf32>
    %c0_21 = arith.constant 0 : index
    %c0_22 = arith.constant 0 : index
    %c0_23 = arith.constant 0 : index
    %28 = vector.load %arg9[%c0_21, %c0_22, %c0_23] : memref<1x1x8xf32, #tpu.memory_space<vmem>>, vector<1x1x8xf32>
    %29 = vector.shape_cast %28 : vector<1x1x8xf32> to vector<1x8xf32>
    %30 = vector.shape_cast %27 : vector<1x8xf32> to vector<1x1x8xf32>
    tpu.vector_store %arg9[%c0_21, %c0_22, %c0_23], %30 {strides = array<i32>} : memref<1x1x8xf32, #tpu.memory_space<vmem>>, vector<1x1x8xf32>,
    return
  }
  func.func @transform_0(%arg0: i32) -> (i32, i32) {
    %c0_i32 = arith.constant 0 : i32
    %c0_i32_0 = arith.constant 0 : i32
    return %arg0, %c0_i32 : i32, i32
  }
  func.func @transform_1(%arg0: i32) -> (i32, i32) {
    %c0_i32 = arith.constant 0 : i32
    %c0_i32_0 = arith.constant 0 : i32
    %c0_i32_1 = arith.constant 0 : i32
    return %c0_i32, %c0_i32_0 : i32, i32
  }
  func.func @transform_2(%arg0: i32) -> (i32, i32) {
    %c0_i32 = arith.constant 0 : i32
    %c0_i32_0 = arith.constant 0 : i32
    %c0_i32_1 = arith.constant 0 : i32
    return %c0_i32, %c0_i32_0 : i32, i32
  }
  func.func @transform_3(%arg0: i32) -> (i32, i32) {
    %c0_i32 = arith.constant 0 : i32
    %c0_i32_0 = arith.constant 0 : i32
    %c0_i32_1 = arith.constant 0 : i32
    return %c0_i32, %c0_i32_0 : i32, i32
  }
  func.func @transform_4(%arg0: i32) -> (i32, i32) {
    %c0_i32 = arith.constant 0 : i32
    %c0_i32_0 = arith.constant 0 : i32
    %c0_i32_1 = arith.constant 0 : i32
    return %c0_i32, %c0_i32_0 : i32, i32
  }
  func.func @transform_5(%arg0: i32) -> (i32, i32) {
    %c0_i32 = arith.constant 0 : i32
    %c0_i32_0 = arith.constant 0 : i32
    %c0_i32_1 = arith.constant 0 : i32
    return %c0_i32, %c0_i32_0 : i32, i32
  }
  func.func @transform_6(%arg0: i32) -> (i32, i32) {
    %c0_i32 = arith.constant 0 : i32
    %c0_i32_0 = arith.constant 0 : i32
    %c0_i32_1 = arith.constant 0 : i32
    return %c0_i32, %c0_i32_0 : i32, i32
  }
  func.func @transform_7(%arg0: i32) -> (i32, i32) {
    %c0_i32 = arith.constant 0 : i32
    %c0_i32_0 = arith.constant 0 : i32
    %c0_i32_1 = arith.constant 0 : i32
    return %c0_i32, %c0_i32_0 : i32, i32
  }
  func.func @transform_8(%arg0: i32) -> (i32, i32, i32) {
    %c0_i32 = arith.constant 0 : i32
    %c0_i32_0 = arith.constant 0 : i32
    %c0_i32_1 = arith.constant 0 : i32
    return %arg0, %c0_i32, %c0_i32_0 : i32, i32, i32
  }
}

</mosaic_0001>

<bundles_post_ra>
// kernel: fraudnet_forward.1
= control target key start
LH: loop header
LB: loop body
LE: loop exit
PB: predicated region body
PF: predicated region fallthrough
CT: control target
= control target key end

     0   :  { %13 = vsyncpa [#allocation3], 0  ;;  %s1101_s0 = inlined_call_operand.vmem [shape: f32[8,32], index: 0, kind: input, shape index: {}]   ;;  %s1102_s1 = inlined_call_operand.hbm [shape: bf16[32,256], index: 1, kind: input, shape index: {}]   ;;  %s1103_s2 = inlined_call_operand.vmem [shape: f32[1,256], index: 2, kind: input, shape index: {}]   ;;  %s1104_s3 = inlined_call_operand.hbm [shape: bf16[256,256], index: 3, kind: input, shape index: {}]   ;;  %s1105_s4 = inlined_call_operand.vmem [shape: f32[1,256], index: 4, kind: input, shape index: {}]   ;;  %s1106_s5 = inlined_call_operand.hbm [shape: bf16[256,256], index: 5, kind: input, shape index: {}]   ;;  %s1107_s6 = inlined_call_operand.vmem [shape: f32[1,256], index: 6, kind: input, shape index: {}]   ;;  %s1108_s7 = inlined_call_operand.vmem [shape: bf16[1,256], index: 7, kind: input, shape index: {}]   ;;  %s1109_s8 = inlined_call_operand.vmem [shape: f32[1,1,8], index: 8, kind: output, shape index: {}]  }
   0x1   :  { %14 = vsyncpa [#allocation5], 0  ;;  %s979_s27 = smov [#allocation4]   ;;  %s980_s29 = smov [#allocation2]  }
   0x2   :  { %s36_s28 = sshll.u32 %s979_s27, 4  ;;  %s22_s30 = sshll.u32 %s980_s29, 4  ;;  %s37_s28 = int_to_ptr.vmem [resolvable:$true] %s36_s28  ;;  %s1031_s30 = int_to_ptr.vmem [resolvable:$true] %s22_s30 }
   0x3   :  { %s909_s11 = scalar_lea.hbm %s1104_s3, 4096 }
   0x4   :  { %p910_p0 = scmp.ne.s32.totalorder %s1104_s3, %s909_s11  ;;  %p913_p1 = scmp.lt.u32.totalorder %s909_s11, %s1104_s3 }
   0x6   :  { %p915_p2 = pnand %p913_p1, %p910_p0 }
   0x8   :  { %918 = shalt.err (!%p915_p2)
}
   0x9   :  { %s919_s16 = scalar_lea.vmem %s37_s28, 4096  ;;  %p924_p4 = scmp.lt.s32.totalorder %s37_s28, %s37_s28 }
   0xa   :  { %p920_p3 = scmp.ne.s32.totalorder %s37_s28, %s919_s16  ;;  %p925_p5 = scmp.lt.s32.totalorder %s919_s16, %s919_s16 }
   0xc   :  { %p926_p6 = por %p925_p5, %p924_p4 }
   0xe   :  { %p927_p7 = pnand %p926_p6, %p920_p3 }
  0x10   :  { %930 = shalt.err (!%p927_p7)
}
  0x11   :  { %s981_s17 = smov 128   ;;  %s982_s18 = smov 8  }
  0x12   :  { %42 = dma.hbm_to_vmem [thread:$0]  %s1104_s3, 4096, %s37_s28, [#allocation5], %s981_s17, %s981_s17, %s982_s18  }
  0x13   :  { %s931_s23 = scalar_lea.hbm %s1102_s1, 512 }
  0x14   :  { %p932_p8 = scmp.ne.s32.totalorder %s1102_s1, %s931_s23  ;;  %p935_p9 = scmp.lt.u32.totalorder %s931_s23, %s1102_s1 }
  0x16   :  { %p937_p10 = pnand %p935_p9, %p932_p8 }
  0x18   :  { %940 = shalt.err (!%p937_p10)
}
  0x19   :  { %s941_s29 = scalar_lea.vmem %s1031_s30, 512  ;;  %p946_p12 = scmp.lt.s32.totalorder %s1031_s30, %s1031_s30 }
  0x1a   :  { %p942_p11 = scmp.ne.s32.totalorder %s1031_s30, %s941_s29  ;;  %p947_p13 = scmp.lt.s32.totalorder %s941_s29, %s941_s29 }
  0x1c   :  { %p948_p0 = por %p947_p13, %p946_p12 }
  0x1e   :  { %p949_p1 = pnand %p948_p0, %p942_p11 }
  0x20   :  { %952 = shalt.err (!%p949_p1)
}
  0x21   :  { %28 = dma.hbm_to_vmem [thread:$0]  %s1102_s1, 512, %s1031_s30, [#allocation3], %s981_s17, %s981_s17, %s982_s18  }
  0x22   :  { %s983_s9 = smov [#allocation6]   ;;  %s953_s13 = scalar_lea.hbm %s1106_s5, 4096 }
  0x23   :  { %s50_s10 = sshll.u32 %s983_s9, 4  ;;  %p954_p2 = scmp.ne.s32.totalorder %s1106_s5, %s953_s13  ;;  %s51_s10 = int_to_ptr.vmem [resolvable:$true] %s50_s10 }
  0x24   :  { %p957_p3 = scmp.lt.u32.totalorder %s953_s13, %s1106_s5 }
  0x26   :  { %p959_p4 = pnand %p957_p3, %p954_p2 }
  0x28   :  { %962 = shalt.err (!%p959_p4)
}
  0x29   :  { %s963_s20 = scalar_lea.vmem %s51_s10, 4096  ;;  %p968_p6 = scmp.lt.s32.totalorder %s51_s10, %s51_s10 }
  0x2a   :  { %p964_p5 = scmp.ne.s32.totalorder %s51_s10, %s963_s20  ;;  %p969_p7 = scmp.lt.s32.totalorder %s963_s20, %s963_s20 }
  0x2c   :  { %p970_p8 = por %p969_p7, %p968_p6 }
  0x2e   :  { %p971_p9 = pnand %p970_p8, %p964_p5 }
  0x30   :  { %974 = shalt.err (!%p971_p9)
}
  0x31   :  { %56 = dma.hbm_to_vmem [thread:$0]  %s1106_s5, 4096, %s51_s10, [#allocation5], %s981_s17, %s981_s17, %s982_s18  }
  0x32   :  { %975 = dma.done.wait [#allocation3], 512  }
  0x33   :  { %976 = vsyncadd [#allocation3], 4294966784 }
  0x34   :  { %977 = dma.done.wait [#allocation5], 8192  }
  0x35   :  { %978 = vsyncadd [#allocation5], 4294959104  ;;  %v984_v0 = vmov 0   ;;  %v807_v1 = vld [vmem:[#allocation2 + $0x4] ss:$8 sps:$4 sm:$0xff]   ;;  %vm109_vm0 = vcmask 261120  }
  0x36   :  { %145 = vmatprep.mubr.bf16.mxu0 %v984_v0  ;;  %v809_v2 = vld [vmem:[#allocation2] ss:$8 sps:$4 sm:$0xff]   ;;  %113 = vmatprep.subr.bf16.mxu0 %v807_v1  ;;  %v810_v3 = vld [vmem:[#allocation2 + $0x14] ss:$8 sps:$4 sm:$0xff]   ;;  %v812_v4 = vld [vmem:[#allocation2 + $0x10] ss:$8 sps:$4 sm:$0xff]  }
  0x37   :  { %v71_v5 = vld [vmem:[%s1101_s0] sm:$0xff]  ;;  %114 = vmatpush1.bf16.msra.mxu0 %v809_v2  ;;  %v816_v8 = vld [vmem:[#allocation4 + $0x14] ss:$8 sps:$4 sm:$0xff]   ;;  %v818_v10 = vld [vmem:[#allocation4 + $0x10] ss:$8 sps:$4 sm:$0xff]   ;;  %vm722_vm1 = vcmask 57344  }
  0x38   :  { %v813_v6 = vld [vmem:[#allocation4 + $0x4] ss:$8 sps:$4 sm:$0xff]   ;;  %115 = vmatprep.subr.bf16.mxu0 %v810_v3  ;;  %v815_v7 = vld [vmem:[#allocation4] ss:$8 sps:$4 sm:$0xff]   ;;  %v72_v9 = vpack.c.bf16 %v71_v5, %v71_v5  ;;  %v822_v13 = vld [vmem:[#allocation4 + $0x34] ss:$8 sps:$4 sm:$0xff]   ;;  %v79_v3 = vlaneseq }
  0x39   :  { %362 = vmatprep.subr.bf16.mxu1 %v813_v6  ;;  %v819_v11 = vld [vmem:[#allocation4 + $0x24] ss:$8 sps:$4 sm:$0xff]   ;;  %v821_v12 = vld [vmem:[#allocation4 + $0x20] ss:$8 sps:$4 sm:$0xff]   ;;  %v824_v14 = vld [vmem:[#allocation4 + $0x30] ss:$8 sps:$4 sm:$0xff]  }
  0x3a   :  { %363 = vmatpush1.bf16.msra.mxu1 %v815_v7  ;;  %v825_v15 = vld [vmem:[#allocation4 + $0x44] ss:$8 sps:$4 sm:$0xff]   ;;  %v827_v16 = vld [vmem:[#allocation4 + $0x40] ss:$8 sps:$4 sm:$0xff]   ;;  %v828_v17 = vld [vmem:[#allocation4 + $0x54] ss:$8 sps:$4 sm:$0xff]  }
  0x3b   :  { %116 = vmatpush1.bf16.msra.mxu0 %v812_v4  ;;  %364 = vmatprep.subr.bf16.mxu1 %v816_v8  ;;  %v830_v18 = vld [vmem:[#allocation4 + $0x50] ss:$8 sps:$4 sm:$0xff]   ;;  %v831_v19 = vld [vmem:[#allocation4 + $0x64] ss:$8 sps:$4 sm:$0xff]   ;;  %v833_v20 = vld [vmem:[#allocation4 + $0x60] ss:$8 sps:$4 sm:$0xff]  }
  0x3c   :  { %v834_v21 = vld [vmem:[#allocation4 + $0x74] ss:$8 sps:$4 sm:$0xff]   ;;  %v836_v22 = vld [vmem:[#allocation4 + $0x70] ss:$8 sps:$4 sm:$0xff]   ;;  %v837_v23 = vld [vmem:[#allocation4 + $0x84] ss:$8 sps:$4 sm:$0xff]  }
  0x3d   :  { %v839_v24 = vld [vmem:[#allocation4 + $0x80] ss:$8 sps:$4 sm:$0xff]   ;;  %v840_v25 = vld [vmem:[#allocation4 + $0x94] ss:$8 sps:$4 sm:$0xff]   ;;  %v842_v26 = vld [vmem:[#allocation4 + $0x90] ss:$8 sps:$4 sm:$0xff]  }
  0x3e   :  { %734 = vmatmul.mubr.msk.bf16.vlgmr.msra.gmra.mrb[0].mxu0 %vm109_vm0, %v72_v9  ;;  %365 = vmatpush1.bf16.msra.mxu1 %v818_v10  ;;  %v843_v27 = vld [vmem:[#allocation4 + $0xa4] ss:$8 sps:$4 sm:$0xff]   ;;  %v845_v28 = vld [vmem:[#allocation4 + $0xa0] ss:$8 sps:$4 sm:$0xff]   ;;  %v846_v29 = vld [vmem:[#allocation4 + $0xb4] ss:$8 sps:$4 sm:$0xff]  }
  0x3f   :  { %366 = vmatprep.subr.bf16.mxu1 %v819_v11  ;;  %v848_v30 = vld [vmem:[#allocation4 + $0xb0] ss:$8 sps:$4 sm:$0xff]   ;;  %v849_v31 = vld [vmem:[#allocation4 + $0xc4] ss:$8 sps:$4 sm:$0xff]   ;;  %v851_v32 = vld [vmem:[#allocation4 + $0xc0] ss:$8 sps:$4 sm:$0xff]  }
  0x40   :  { %v852_v33 = vld [vmem:[#allocation4 + $0xd4] ss:$8 sps:$4 sm:$0xff]   ;;  %v854_v34 = vld [vmem:[#allocation4 + $0xd0] ss:$8 sps:$4 sm:$0xff]   ;;  %v855_v35 = vld [vmem:[#allocation4 + $0xe4] ss:$8 sps:$4 sm:$0xff]  }
  0x41   :  { %v857_v36 = vld [vmem:[#allocation4 + $0xe0] ss:$8 sps:$4 sm:$0xff]   ;;  %v858_v37 = vld [vmem:[#allocation4 + $0xf4] ss:$8 sps:$4 sm:$0xff]   ;;  %v860_v38 = vld [vmem:[#allocation4 + $0xf0] ss:$8 sps:$4 sm:$0xff]  }
  0x42   :  { %367 = vmatpush1.bf16.msra.mxu1 %v821_v12  ;;  %v861_v39 = vld [vmem:[#allocation6] ss:$8 sps:$4 sm:$0xff]   ;;  %v863_v40 = vld [vmem:[#allocation6 + $0x4] ss:$8 sps:$4 sm:$0xff]   ;;  %v866_v41 = vld [vmem:[#allocation6 + $0x14] ss:$8 sps:$4 sm:$0xff]  }
  0x43   :  { %368 = vmatprep.subr.bf16.mxu1 %v822_v13  ;;  %611 = vmatprep.subr.bf16.mxu0 %v863_v40  ;;  %v864_v42 = vld [vmem:[#allocation6 + $0x10] ss:$8 sps:$4 sm:$0xff]   ;;  %v869_v43 = vld [vmem:[#allocation6 + $0x24] ss:$8 sps:$4 sm:$0xff]   ;;  %v867_v44 = vld [vmem:[#allocation6 + $0x20] ss:$8 sps:$4 sm:$0xff]  }
  0x44   :  { %612 = vmatpush1.bf16.msra.mxu0 %v861_v39  ;;  %v872_v45 = vld [vmem:[#allocation6 + $0x34] ss:$8 sps:$4 sm:$0xff]   ;;  %v870_v46 = vld [vmem:[#allocation6 + $0x30] ss:$8 sps:$4 sm:$0xff]   ;;  %v875_v47 = vld [vmem:[#allocation6 + $0x44] ss:$8 sps:$4 sm:$0xff]  }
  0x45   :  { %613 = vmatprep.subr.bf16.mxu0 %v866_v41  ;;  %v873_v48 = vld [vmem:[#allocation6 + $0x40] ss:$8 sps:$4 sm:$0xff]   ;;  %v878_v49 = vld [vmem:[#allocation6 + $0x54] ss:$8 sps:$4 sm:$0xff]   ;;  %v876_v50 = vld [vmem:[#allocation6 + $0x50] ss:$8 sps:$4 sm:$0xff]  }
  0x46   :  { %369 = vmatpush1.bf16.msra.mxu1 %v824_v14  ;;  %v881_v51 = vld [vmem:[#allocation6 + $0x64] ss:$8 sps:$4 sm:$0xff]   ;;  %v879_v52 = vld [vmem:[#allocation6 + $0x60] ss:$8 sps:$4 sm:$0xff]   ;;  %v884_v53 = vld [vmem:[#allocation6 + $0x74] ss:$8 sps:$4 sm:$0xff]  }
  0x47   :  { %370 = vmatprep.subr.bf16.mxu1 %v825_v15  ;;  %v882_v54 = vld [vmem:[#allocation6 + $0x70] ss:$8 sps:$4 sm:$0xff]   ;;  %v887_v55 = vld [vmem:[#allocation6 + $0x84] ss:$8 sps:$4 sm:$0xff]   ;;  %v885_v56 = vld [vmem:[#allocation6 + $0x80] ss:$8 sps:$4 sm:$0xff]  }
  0x48   :  { %614 = vmatpush1.bf16.msra.mxu0 %v864_v42  ;;  %v890_v57 = vld [vmem:[#allocation6 + $0x94] ss:$8 sps:$4 sm:$0xff]   ;;  %v888_v58 = vld [vmem:[#allocation6 + $0x90] ss:$8 sps:$4 sm:$0xff]   ;;  %v893_v59 = vld [vmem:[#allocation6 + $0xa4] ss:$8 sps:$4 sm:$0xff]  }
  0x49   :  { %615 = vmatprep.subr.bf16.mxu0 %v869_v43  ;;  %v891_v60 = vld [vmem:[#allocation6 + $0xa0] ss:$8 sps:$4 sm:$0xff]   ;;  %v896_v61 = vld [vmem:[#allocation6 + $0xb4] ss:$8 sps:$4 sm:$0xff]   ;;  %v894_v62 = vld [vmem:[#allocation6 + $0xb0] ss:$8 sps:$4 sm:$0xff]  }
  0x4a   :  { %371 = vmatpush1.bf16.msra.mxu1 %v827_v16  ;;  %v899_v63 = vld [vmem:[#allocation6 + $0xc4] ss:$8 sps:$4 sm:$0xff]   ;;  %v897_v0 = vld [vmem:[#allocation6 + $0xc0] ss:$8 sps:$4 sm:$0xff]   ;;  %v902_v1 = vld [vmem:[#allocation6 + $0xd4] ss:$8 sps:$4 sm:$0xff]  }
  0x4b   :  { %372 = vmatprep.subr.bf16.mxu1 %v828_v17  ;;  %v900_v2 = vld [vmem:[#allocation6 + $0xd0] ss:$8 sps:$4 sm:$0xff]   ;;  %v80_v4 = vshrl.u32 %v79_v3, 7  ;;  %v77_v6 = vld [vmem:[%s1103_s2] sm:$0x3] }
  0x4c   :  { %616 = vmatpush1.bf16.msra.mxu0 %v867_v44  ;;  %v799_v39 = vld.sshfl [vmem:[%s1108_s7] sm:$0x11 pattern:$0x75316420] }
  0x4d   :  { %617 = vmatprep.subr.bf16.mxu0 %v872_v45  ;;  %v81_v5 = vsub.s32 0, %v80_v4  ;;  %v85_v7 = vsub.s32 1, %v80_v4  ;;  %v665_v41 = vcombine.high %v799_v39, %v799_v39  ;;  %v439_v45 = vld [vmem:[%s1107_s6] sm:$0x3] }
  0x4e   :  { %373 = vmatpush1.bf16.msra.mxu1 %v830_v18 }
  0x4f   :  { %374 = vmatprep.subr.bf16.mxu1 %v831_v19  ;;  %v82_v8 = vrot.slane %v77_v6, %v81_v5  ;;  %v86_v9 = vrot.slane %v77_v6, %v85_v7 }
  0x50   :  { %618 = vmatpush1.bf16.msra.mxu0 %v870_v46  ;;  %v444_v46 = vrot.slane %v439_v45, %v81_v5 }
  0x51   :  { %619 = vmatprep.subr.bf16.mxu0 %v875_v47  ;;  %v448_v47 = vrot.slane %v439_v45, %v85_v7 }
  0x52   :  { %375 = vmatpush1.bf16.msra.mxu1 %v833_v20  ;;  %v905_v20 = vld [vmem:[#allocation6 + $0xe4] ss:$8 sps:$4 sm:$0xff]  }
  0x53   :  { %376 = vmatprep.subr.bf16.mxu1 %v834_v21  ;;  %v903_v21 = vld [vmem:[#allocation6 + $0xe0] ss:$8 sps:$4 sm:$0xff]  }
  0x54   :  { %620 = vmatpush1.bf16.msra.mxu0 %v873_v48 }
  0x55   :  { %621 = vmatprep.subr.bf16.mxu0 %v878_v49 }
  0x56   :  { %377 = vmatpush1.bf16.msra.mxu1 %v836_v22  ;;  %v908_v22 = vld [vmem:[#allocation6 + $0xf4] ss:$8 sps:$4 sm:$0xff]  }
  0x57   :  { %378 = vmatprep.subr.bf16.mxu1 %v837_v23  ;;  %v906_v23 = vld [vmem:[#allocation6 + $0xf0] ss:$8 sps:$4 sm:$0xff]  }
  0x58   :  { %622 = vmatpush1.bf16.msra.mxu0 %v876_v50 }
  0x59   :  { %623 = vmatprep.subr.bf16.mxu0 %v881_v51 }
  0x5a   :  { %379 = vmatpush1.bf16.msra.mxu1 %v839_v24  ;;  %v190_v24 = vld [vmem:[%s1105_s4] sm:$0x3] }
  0x5b   :  { %380 = vmatprep.subr.bf16.mxu1 %v840_v25  ;;  %v195_v25 = vrot.slane %v190_v24, %v81_v5 }
  0x5c   :  { %624 = vmatpush1.bf16.msra.mxu0 %v879_v52 }
  0x5d   :  { %625 = vmatprep.subr.bf16.mxu0 %v884_v53 }
  0x5e   :  { %381 = vmatpush1.bf16.msra.mxu1 %v842_v26  ;;  %v199_v26 = vrot.slane %v190_v24, %v85_v7 }
  0x5f   :  { %382 = vmatprep.subr.bf16.mxu1 %v843_v27 }
  0x60   :  { %626 = vmatpush1.bf16.msra.mxu0 %v882_v54 }
  0x61   :  { %627 = vmatprep.subr.bf16.mxu0 %v887_v55 }
  0x62   :  { %383 = vmatpush1.bf16.msra.mxu1 %v845_v28 }
  0x63   :  { %384 = vmatprep.subr.bf16.mxu1 %v846_v29 }
  0x64   :  { %628 = vmatpush1.bf16.msra.mxu0 %v885_v56 }
  0x65   :  { %629 = vmatprep.subr.bf16.mxu0 %v890_v57 }
  0x66   :  { %385 = vmatpush1.bf16.msra.mxu1 %v848_v30 }
  0x67   :  { %386 = vmatprep.subr.bf16.mxu1 %v849_v31 }
  0x68   :  { %630 = vmatpush1.bf16.msra.mxu0 %v888_v58 }
  0x69   :  { %631 = vmatprep.subr.bf16.mxu0 %v893_v59 }
  0x6a   :  { %387 = vmatpush1.bf16.msra.mxu1 %v851_v32 }
  0x6b   :  { %388 = vmatprep.subr.bf16.mxu1 %v852_v33 }
  0x6c   :  { %632 = vmatpush1.bf16.msra.mxu0 %v891_v60 }
  0x6d   :  { %633 = vmatprep.subr.bf16.mxu0 %v896_v61 }
  0x6e   :  { %389 = vmatpush1.bf16.msra.mxu1 %v854_v34 }
  0x6f   :  { %390 = vmatprep.subr.bf16.mxu1 %v855_v35 }
  0x70   :  { %634 = vmatpush1.bf16.msra.mxu0 %v894_v62 }
  0x71   :  { %635 = vmatprep.subr.bf16.mxu0 %v899_v63 }
  0x72   :  { %391 = vmatpush1.bf16.msra.mxu1 %v857_v36 }
  0x73   :  { %392 = vmatprep.subr.bf16.mxu1 %v858_v37  ;;  %v985_v37 = vmov 1966171168  }
  0x74   :  { %636 = vmatpush1.bf16.msra.mxu0 %v897_v0 }
  0x75   :  { %637 = vmatprep.subr.bf16.mxu0 %v902_v1 }
  0x76   :  { %393 = vmatpush1.bf16.msra.mxu1 %v860_v38  ;;  %v667_v38 = vunpack.c.l.s4 %v985_v37 }
  0x78   :  { %638 = vmatpush1.bf16.msra.mxu0 %v900_v2  ;;  %v668_v40 = vunpack.c.0.s8 %v667_v38 }
  0x79   :  { %639 = vmatprep.subr.bf16.mxu0 %v905_v20 }
  0x7a   :  { %v671_v42 = vsub.s32 %v668_v40, %v80_v4 }
  0x7c   :  { %640 = vmatpush1.bf16.msra.mxu0 %v903_v21  ;;  %v679_v43 = vrot.slane %v665_v41, %v671_v42  ;;  %v672_v44 = vrot.slane %v799_v39, %v671_v42 }
  0x7d   :  { %641 = vmatprep.subr.bf16.mxu0 %v908_v22 }
  0x80   :  { %642 = vmatpush1.bf16.msra.mxu0 %v906_v23 }
 0x111   :  { %v147_v10 = vpop.f32.mrb[0].mxu0 }
 0x112   :  { %v148_v11 = vadd.f32 %v147_v10, %v82_v8  ;;  %v149_v12 = vpop.f32.mrb[1].mxu0 }
 0x113   :  { %v150_v13 = vadd.f32 %v149_v12, %v86_v9  ;;  %v151_v14 = vpop.f32.mrb[2].mxu0 }
 0x114   :  { %v154_v15 = vmax.f32 %v148_v11, 0.0  ;;  %v152_v16 = vpop.f32.mrb[3].mxu0 }
 0x115   :  { %v155_v17 = vmax.f32 %v150_v13, 0.0 }
 0x116   :  { %v156_v19 = vpack.c.bf16 %v154_v15, %v154_v15 }
 0x117   :  { %v157_v18 = vpack.c.bf16 %v155_v17, %v155_v17 }
 0x119   :  { %394 = vmatprep.mubr.bf16.mxu1 %v157_v18 }
 0x11a   :  { %395 = vmatmul.mubr.bf16.vlgmr.msra.gmra.mrb[0].mxu1 %v156_v19 }
 0x11b   :  { %714 = vmatprep.mubr.bf16.mxu1 %v679_v43 }
 0x1ed   :  { %v396_v27 = vpop.f32.mrb[0].mxu1 }
 0x1ee   :  { %v397_v28 = vadd.f32 %v396_v27, %v195_v25  ;;  %v398_v29 = vpop.f32.mrb[1].mxu1 }
 0x1ef   :  { %v399_v30 = vadd.f32 %v398_v29, %v199_v26  ;;  %v400_v31 = vpop.f32.mrb[2].mxu1 }
 0x1f0   :  { %v403_v32 = vmax.f32 %v397_v28, 0.0  ;;  %v401_v33 = vpop.f32.mrb[3].mxu1 }
 0x1f1   :  { %v404_v34 = vmax.f32 %v399_v30, 0.0 }
 0x1f2   :  { %v405_v36 = vpack.c.bf16 %v403_v32, %v403_v32 }
 0x1f3   :  { %v406_v35 = vpack.c.bf16 %v404_v34, %v404_v34 }
 0x1f5   :  { %643 = vmatprep.mubr.bf16.mxu0 %v406_v35 }
 0x1f6   :  { %644 = vmatmul.mubr.bf16.vlgmr.msra.gmra.mrb[4].mxu0 %v405_v36 }
 0x2c9   :  { %v645_v48 = vpop.f32.mrb[4].mxu0 }
 0x2ca   :  { %v646_v49 = vadd.f32 %v645_v48, %v444_v46  ;;  %v647_v50 = vpop.f32.mrb[5].mxu0 }
 0x2cb   :  { %v648_v51 = vadd.f32 %v647_v50, %v448_v47  ;;  %v649_v52 = vpop.f32.mrb[6].mxu0 }
 0x2cc   :  { %v652_v53 = vmax.f32 %v646_v49, 0.0  ;;  %v650_v54 = vpop.f32.mrb[7].mxu0 }
 0x2cd   :  { %v653_v55 = vmax.f32 %v648_v51, 0.0 }
 0x2ce   :  { %v655_v57 = vpack.c.bf16 %v652_v53, %v652_v53 }
 0x2cf   :  { %v656_v56 = vpack.c.bf16 %v653_v55, %v653_v55 }
 0x2d1   :  { %682 = vmatprep.subr.bf16.mxu1 %v656_v56 }
 0x2d2   :  { %683 = vmatpush1.bf16.xpose.msra.mxu1 %v655_v57 }
 0x2d9   :  { %715 = vmatmul.mubr.bf16.vlgmr.msra.gmra.mrb[4].mxu1 %v672_v44 }
 0x3ac   :  { %v716_v58 = vpop.f32.mrb[4].mxu1 }
 0x3ad   :  { %723 = vst.msk [vmem:[%s1109_s8] sm:$0x1] %vm722_vm1, %v716_v58  ;;  %v718_v59 = vpop.f32.mrb[5].mxu1 }
 0x3ae   :  { %v719_v60 = vpop.f32.mrb[6].mxu1 }
 0x3af   :  { %v720_v61 = vpop.f32.mrb[7].mxu1 }
 0x3b0   :  { %728 = vsyncpa [#allocation3], 1 }
 0x3b1   :  { %729 = vsyncpa [#allocation5], 1 }

</bundles_post_ra>
